<compile_context>
chip_gen: v6e
topology: v6e:2x2x1
jax: 0.10.0
libtpu: 0.0.40
codegen_flags: <defaults>
</compile_context>

<pallas_src>
import functools

import jax
import jax.numpy as jnp
from jax.experimental import pallas as pl
from jax.experimental.pallas import tpu as pltpu

_LANE = 128     # TPU lane width: last-dim padding target
_SUBLANE = 8    # f32 sublane count: second-to-last-dim padding target

_VMEM_SPEC = pl.BlockSpec(memory_space=pltpu.MemorySpace.VMEM)


def _round_up(x, m):
    return ((x + m - 1) // m) * m


# ----------------------------------------------------------------------------
# Fused kernel: all GINConv layers + fc head in one pass, x kept on-chip.
# ----------------------------------------------------------------------------
def _gin_fused_kernel(*refs, num_conv, fc_is_mlp):
    """refs = (a_ref, x_ref, conv params (w1,b1,w2,b2)*, fc params..., o_ref)."""
    a = refs[0][...]          # (Np, Np) adjacency with (1+eps)*I folded in
    x = refs[1][...]          # (Np, Fp) node features (zero-padded)
    idx = 2
    for _ in range(num_conv):
        w1, b1, w2, b2 = (refs[idx + i][...] for i in range(4))
        idx += 4
        # GIN aggregation: A' @ x  (self-loop already folded into A').
        agg = jnp.dot(a, x, preferred_element_type=jnp.float32)
        # MLP(agg) = lin2(relu(lin1(agg))); GIN.forward applies ReLU on top.
        h = jnp.maximum(
            jnp.dot(agg, w1, preferred_element_type=jnp.float32) + b1, 0.0)
        x = jnp.maximum(
            jnp.dot(h, w2, preferred_element_type=jnp.float32) + b2, 0.0)
        # F.dropout(p=0.5, training=False) -> identity in eval mode.
    if fc_is_mlp:   # Sequential(Linear, ReLU, Linear)
        w1, b1, w2, b2 = (refs[idx + i][...] for i in range(4))
        idx += 4
        h = jnp.maximum(
            jnp.dot(x, w1, preferred_element_type=jnp.float32) + b1, 0.0)
        out = jnp.dot(h, w2, preferred_element_type=jnp.float32) + b2
    else:           # single-layer GIN variant: plain Linear head
        w, b = refs[idx][...], refs[idx + 1][...]
        idx += 2
        out = jnp.dot(x, w, preferred_element_type=jnp.float32) + b
    refs[idx][...] = out      # output ref is the last one


# ----------------------------------------------------------------------------
# Forward wrapper: pads to lane/sublane-dense shapes, folds self-loops,
# launches the single fused kernel, slices the logical output back out.
# ----------------------------------------------------------------------------
def gin_forward(params, x, adj, *, eps=0.0):
    n, feat = x.shape
    convs = params["convs"]
    fc = params["fc"]
    fc_is_mlp = "w1" in fc

    n_pad = _round_up(n, _SUBLANE)

    def pad2(m, rows, cols):
        return jnp.pad(m, ((0, rows - m.shape[0]), (0, cols - m.shape[1])))

    # Fold the GIN self-loop term (1+eps)*x_i into the adjacency, then pad.
    a = adj.astype(jnp.float32) + (1.0 + eps) * jnp.eye(n, dtype=jnp.float32)
    a_p = pad2(a, n_pad, n_pad)
    x_p = pad2(x.astype(jnp.float32), n_pad, _round_up(feat, _LANE))

    operands = [a_p, x_p]
    flops = 0
    d_in = x_p.shape[1]
    for c in convs:
        d_out = _round_up(c["w1"].shape[1], _LANE)
        operands += [pad2(c["w1"], d_in, d_out), pad2(c["b1"], 1, d_out),
                     pad2(c["w2"], d_out, d_out), pad2(c["b2"], 1, d_out)]
        flops += 2 * n_pad * n_pad * d_in          # aggregation A' @ x
        flops += 2 * n_pad * d_in * d_out          # linear1
        flops += 2 * n_pad * d_out * d_out         # linear2
        d_in = d_out
    if fc_is_mlp:
        h_dim = _round_up(fc["w1"].shape[1], _LANE)
        e_dim = _round_up(fc["w2"].shape[1], _LANE)
        operands += [pad2(fc["w1"], d_in, h_dim), pad2(fc["b1"], 1, h_dim),
                     pad2(fc["w2"], h_dim, e_dim), pad2(fc["b2"], 1, e_dim)]
        flops += 2 * n_pad * d_in * h_dim + 2 * n_pad * h_dim * e_dim
        out_dim = fc["w2"].shape[1]
    else:
        e_dim = _round_up(fc["w"].shape[1], _LANE)
        operands += [pad2(fc["w"], d_in, e_dim), pad2(fc["b"], 1, e_dim)]
        flops += 2 * n_pad * d_in * e_dim
        out_dim = fc["w"].shape[1]
    out_pad = e_dim

    bytes_accessed = sum(op.size * op.dtype.itemsize for op in operands)
    bytes_accessed += n_pad * out_pad * 4

    # TODO(synk): for large graphs (N >~ 2k) the O(N^2) adjacency no longer fits
    # in scoped VMEM; that path needs a gridded kernel tiling A over (rows, K)
    # with a VMEM accumulator ("parallel", "arbitrary") instead of this fused
    # single-block design.

    kernel = functools.partial(_gin_fused_kernel,
                               num_conv=len(convs), fc_is_mlp=fc_is_mlp)
    out = pl.pallas_call(
        kernel,
        out_shape=jax.ShapeDtypeStruct((n_pad, out_pad), jnp.float32),
        in_specs=[_VMEM_SPEC] * len(operands),
        out_specs=_VMEM_SPEC,
        cost_estimate=pl.CostEstimate(flops=flops, transcendentals=0,
                                      bytes_accessed=bytes_accessed),
    )(*operands)
    return out[:n, :out_dim]


# ----------------------------------------------------------------------------
# Parameter construction (xavier_uniform weights, zero bias — matches __init__)
# ----------------------------------------------------------------------------
def _xavier_uniform(key, fan_in, fan_out):
    a = (6.0 / (fan_in + fan_out)) ** 0.5
    # stored as (in, out) so the kernel computes x @ W + b
    return jax.random.uniform(key, (fan_in, fan_out), jnp.float32, -a, a)


def _mlp_params(key, in_dim, out_dim):
    k1, k2 = jax.random.split(key)
    return dict(
        w1=_xavier_uniform(k1, in_dim, out_dim),
        b1=jnp.zeros((1, out_dim), jnp.float32),
        w2=_xavier_uniform(k2, out_dim, out_dim),
        b2=jnp.zeros((1, out_dim), jnp.float32),
    )


def init_gin_params(key, feat_dim, num_layers, hidden_dim, embed_dim):
    keys = jax.random.split(key, num_layers + 1)
    convs = [_mlp_params(keys[0], feat_dim, hidden_dim)]
    for i in range(num_layers - 2):
        convs.append(_mlp_params(keys[1 + i], hidden_dim, hidden_dim))
    if num_layers > 1:
        convs.append(_mlp_params(keys[num_layers - 1], hidden_dim, embed_dim))
        kf1, kf2 = jax.random.split(keys[num_layers])
        fc = dict(
            w1=_xavier_uniform(kf1, embed_dim, hidden_dim),
            b1=jnp.zeros((1, hidden_dim), jnp.float32),
            w2=_xavier_uniform(kf2, hidden_dim, embed_dim),
            b2=jnp.zeros((1, embed_dim), jnp.float32),
        )
    else:
        fc = dict(
            w=_xavier_uniform(keys[num_layers], hidden_dim, embed_dim),
            b=jnp.zeros((1, embed_dim), jnp.float32),
        )
    return {"convs": convs, "fc": fc}


# ----------------------------------------------------------------------------
# Example
# ----------------------------------------------------------------------------
if __name__ == "__main__":
    key = jax.random.PRNGKey(0)
    k_x, k_e, k_p = jax.random.split(key, 3)

    num_nodes = 8
    feat_dim = 16
    num_layers = 3
    hidden_dim = 32
    embed_dim = 16
    num_edges = 24

    x = jax.random.normal(k_x, (num_nodes, feat_dim), jnp.float32)

    # edge_index: (2, E) with row 0 = source, row 1 = target
    edge_index = jax.random.randint(k_e, (2, num_edges), 0, num_nodes)
    src, dst = edge_index[0], edge_index[1]
    # dense adjacency: adj[i, j] = #edges j -> i  (sum-aggregation == adj @ x)
    adj = jnp.zeros((num_nodes, num_nodes), jnp.float32).at[dst, src].add(1.0)

    params = init_gin_params(k_p, feat_dim, num_layers, hidden_dim, embed_dim)

    out = gin_forward(params, x, adj)
    jax.block_until_ready(out)
    assert out.shape == (num_nodes, embed_dim)
    print("KERNEL_OK")
</pallas_src>

<mosaic_0001>
module attributes {stable_mosaic.version = 11 : i64} {
  func.func @_gin_fused_kernel(%arg0: memref<8x8xf32, #tpu.memory_space<vmem>>, %arg1: memref<8x128xf32, #tpu.memory_space<vmem>>, %arg2: memref<128x128xf32, #tpu.memory_space<vmem>>, %arg3: memref<1x128xf32, #tpu.memory_space<vmem>>, %arg4: memref<128x128xf32, #tpu.memory_space<vmem>>, %arg5: memref<1x128xf32, #tpu.memory_space<vmem>>, %arg6: memref<128x128xf32, #tpu.memory_space<vmem>>, %arg7: memref<1x128xf32, #tpu.memory_space<vmem>>, %arg8: memref<128x128xf32, #tpu.memory_space<vmem>>, %arg9: memref<1x128xf32, #tpu.memory_space<vmem>>, %arg10: memref<128x128xf32, #tpu.memory_space<vmem>>, %arg11: memref<1x128xf32, #tpu.memory_space<vmem>>, %arg12: memref<128x128xf32, #tpu.memory_space<vmem>>, %arg13: memref<1x128xf32, #tpu.memory_space<vmem>>, %arg14: memref<128x128xf32, #tpu.memory_space<vmem>>, %arg15: memref<1x128xf32, #tpu.memory_space<vmem>>, %arg16: memref<128x128xf32, #tpu.memory_space<vmem>>, %arg17: memref<1x128xf32, #tpu.memory_space<vmem>>, %arg18: memref<8x128xf32, #tpu.memory_space<vmem>>) attributes {dimension_semantics = [], scalar_prefetch = 0 : i64, scratch_operands = 0 : i64, tpu.core_type = #tpu.core_type<tc>} {
    %c0 = arith.constant 0 : index
    %c0_0 = arith.constant 0 : index
    %0 = vector.load %arg0[%c0, %c0_0] : memref<8x8xf32, #tpu.memory_space<vmem>>, vector<8x8xf32>
    %c0_1 = arith.constant 0 : index
    %c0_2 = arith.constant 0 : index
    %1 = vector.load %arg1[%c0_1, %c0_2] : memref<8x128xf32, #tpu.memory_space<vmem>>, vector<8x128xf32>
    %c0_3 = arith.constant 0 : index
    %c0_4 = arith.constant 0 : index
    %2 = vector.load %arg2[%c0_3, %c0_4] : memref<128x128xf32, #tpu.memory_space<vmem>>, vector<128x128xf32>
    %c0_5 = arith.constant 0 : index
    %c0_6 = arith.constant 0 : index
    %3 = vector.load %arg3[%c0_5, %c0_6] : memref<1x128xf32, #tpu.memory_space<vmem>>, vector<1x128xf32>
    %c0_7 = arith.constant 0 : index
    %c0_8 = arith.constant 0 : index
    %4 = vector.load %arg4[%c0_7, %c0_8] : memref<128x128xf32, #tpu.memory_space<vmem>>, vector<128x128xf32>
    %c0_9 = arith.constant 0 : index
    %c0_10 = arith.constant 0 : index
    %5 = vector.load %arg5[%c0_9, %c0_10] : memref<1x128xf32, #tpu.memory_space<vmem>>, vector<1x128xf32>
    %cst = arith.constant dense<0.000000e+00> : vector<8x128xf32>
    %6 = tpu.matmul %0, %1, %cst {dimension_numbers = #tpu.dot_dimension_numbers<[1], [0], [0], [1], [0, 0, 1, 1], [], []>} : vector<8x8xf32>, vector<8x128xf32>, vector<8x128xf32> -> vector<8x128xf32>
    %cst_11 = arith.constant dense<0.000000e+00> : vector<8x128xf32>
    %7 = tpu.matmul %6, %2, %cst_11 {dimension_numbers = #tpu.dot_dimension_numbers<[1], [0], [0], [1], [0, 0, 1, 1], [], []>} : vector<8x128xf32>, vector<128x128xf32>, vector<8x128xf32> -> vector<8x128xf32>
    %8 = vector.broadcast %3 : vector<1x128xf32> to vector<8x128xf32>
    %9 = arith.addf %7, %8 : vector<8x128xf32>
    %cst_12 = arith.constant 0.000000e+00 : f32
    %10 = vector.broadcast %cst_12 : f32 to vector<8x128xf32>
    %11 = arith.maximumf %9, %10 : vector<8x128xf32>
    %cst_13 = arith.constant dense<0.000000e+00> : vector<8x128xf32>
    %12 = tpu.matmul %11, %4, %cst_13 {dimension_numbers = #tpu.dot_dimension_numbers<[1], [0], [0], [1], [0, 0, 1, 1], [], []>} : vector<8x128xf32>, vector<128x128xf32>, vector<8x128xf32> -> vector<8x128xf32>
    %13 = vector.broadcast %5 : vector<1x128xf32> to vector<8x128xf32>
    %14 = arith.addf %12, %13 : vector<8x128xf32>
    %cst_14 = arith.constant 0.000000e+00 : f32
    %15 = vector.broadcast %cst_14 : f32 to vector<8x128xf32>
    %16 = arith.maximumf %14, %15 : vector<8x128xf32>
    %c0_15 = arith.constant 0 : index
    %c0_16 = arith.constant 0 : index
    %17 = vector.load %arg6[%c0_15, %c0_16] : memref<128x128xf32, #tpu.memory_space<vmem>>, vector<128x128xf32>
    %c0_17 = arith.constant 0 : index
    %c0_18 = arith.constant 0 : index
    %18 = vector.load %arg7[%c0_17, %c0_18] : memref<1x128xf32, #tpu.memory_space<vmem>>, vector<1x128xf32>
    %c0_19 = arith.constant 0 : index
    %c0_20 = arith.constant 0 : index
    %19 = vector.load %arg8[%c0_19, %c0_20] : memref<128x128xf32, #tpu.memory_space<vmem>>, vector<128x128xf32>
    %c0_21 = arith.constant 0 : index
    %c0_22 = arith.constant 0 : index
    %20 = vector.load %arg9[%c0_21, %c0_22] : memref<1x128xf32, #tpu.memory_space<vmem>>, vector<1x128xf32>
    %cst_23 = arith.constant dense<0.000000e+00> : vector<8x128xf32>
    %21 = tpu.matmul %0, %16, %cst_23 {dimension_numbers = #tpu.dot_dimension_numbers<[1], [0], [0], [1], [0, 0, 1, 1], [], []>} : vector<8x8xf32>, vector<8x128xf32>, vector<8x128xf32> -> vector<8x128xf32>
    %cst_24 = arith.constant dense<0.000000e+00> : vector<8x128xf32>
    %22 = tpu.matmul %21, %17, %cst_24 {dimension_numbers = #tpu.dot_dimension_numbers<[1], [0], [0], [1], [0, 0, 1, 1], [], []>} : vector<8x128xf32>, vector<128x128xf32>, vector<8x128xf32> -> vector<8x128xf32>
    %23 = vector.broadcast %18 : vector<1x128xf32> to vector<8x128xf32>
    %24 = arith.addf %22, %23 : vector<8x128xf32>
    %cst_25 = arith.constant 0.000000e+00 : f32
    %25 = vector.broadcast %cst_25 : f32 to vector<8x128xf32>
    %26 = arith.maximumf %24, %25 : vector<8x128xf32>
    %cst_26 = arith.constant dense<0.000000e+00> : vector<8x128xf32>
    %27 = tpu.matmul %26, %19, %cst_26 {dimension_numbers = #tpu.dot_dimension_numbers<[1], [0], [0], [1], [0, 0, 1, 1], [], []>} : vector<8x128xf32>, vector<128x128xf32>, vector<8x128xf32> -> vector<8x128xf32>
    %28 = vector.broadcast %20 : vector<1x128xf32> to vector<8x128xf32>
    %29 = arith.addf %27, %28 : vector<8x128xf32>
    %cst_27 = arith.constant 0.000000e+00 : f32
    %30 = vector.broadcast %cst_27 : f32 to vector<8x128xf32>
    %31 = arith.maximumf %29, %30 : vector<8x128xf32>
    %c0_28 = arith.constant 0 : index
    %c0_29 = arith.constant 0 : index
    %32 = vector.load %arg10[%c0_28, %c0_29] : memref<128x128xf32, #tpu.memory_space<vmem>>, vector<128x128xf32>
    %c0_30 = arith.constant 0 : index
    %c0_31 = arith.constant 0 : index
    %33 = vector.load %arg11[%c0_30, %c0_31] : memref<1x128xf32, #tpu.memory_space<vmem>>, vector<1x128xf32>
    %c0_32 = arith.constant 0 : index
    %c0_33 = arith.constant 0 : index
    %34 = vector.load %arg12[%c0_32, %c0_33] : memref<128x128xf32, #tpu.memory_space<vmem>>, vector<128x128xf32>
    %c0_34 = arith.constant 0 : index
    %c0_35 = arith.constant 0 : index
    %35 = vector.load %arg13[%c0_34, %c0_35] : memref<1x128xf32, #tpu.memory_space<vmem>>, vector<1x128xf32>
    %cst_36 = arith.constant dense<0.000000e+00> : vector<8x128xf32>
    %36 = tpu.matmul %0, %31, %cst_36 {dimension_numbers = #tpu.dot_dimension_numbers<[1], [0], [0], [1], [0, 0, 1, 1], [], []>} : vector<8x8xf32>, vector<8x128xf32>, vector<8x128xf32> -> vector<8x128xf32>
    %cst_37 = arith.constant dense<0.000000e+00> : vector<8x128xf32>
    %37 = tpu.matmul %36, %32, %cst_37 {dimension_numbers = #tpu.dot_dimension_numbers<[1], [0], [0], [1], [0, 0, 1, 1], [], []>} : vector<8x128xf32>, vector<128x128xf32>, vector<8x128xf32> -> vector<8x128xf32>
    %38 = vector.broadcast %33 : vector<1x128xf32> to vector<8x128xf32>
    %39 = arith.addf %37, %38 : vector<8x128xf32>
    %cst_38 = arith.constant 0.000000e+00 : f32
    %40 = vector.broadcast %cst_38 : f32 to vector<8x128xf32>
    %41 = arith.maximumf %39, %40 : vector<8x128xf32>
    %cst_39 = arith.constant dense<0.000000e+00> : vector<8x128xf32>
    %42 = tpu.matmul %41, %34, %cst_39 {dimension_numbers = #tpu.dot_dimension_numbers<[1], [0], [0], [1], [0, 0, 1, 1], [], []>} : vector<8x128xf32>, vector<128x128xf32>, vector<8x128xf32> -> vector<8x128xf32>
    %43 = vector.broadcast %35 : vector<1x128xf32> to vector<8x128xf32>
    %44 = arith.addf %42, %43 : vector<8x128xf32>
    %cst_40 = arith.constant 0.000000e+00 : f32
    %45 = vector.broadcast %cst_40 : f32 to vector<8x128xf32>
    %46 = arith.maximumf %44, %45 : vector<8x128xf32>
    %c0_41 = arith.constant 0 : index
    %c0_42 = arith.constant 0 : index
    %47 = vector.load %arg14[%c0_41, %c0_42] : memref<128x128xf32, #tpu.memory_space<vmem>>, vector<128x128xf32>
    %c0_43 = arith.constant 0 : index
    %c0_44 = arith.constant 0 : index
    %48 = vector.load %arg15[%c0_43, %c0_44] : memref<1x128xf32, #tpu.memory_space<vmem>>, vector<1x128xf32>
    %c0_45 = arith.constant 0 : index
    %c0_46 = arith.constant 0 : index
    %49 = vector.load %arg16[%c0_45, %c0_46] : memref<128x128xf32, #tpu.memory_space<vmem>>, vector<128x128xf32>
    %c0_47 = arith.constant 0 : index
    %c0_48 = arith.constant 0 : index
    %50 = vector.load %arg17[%c0_47, %c0_48] : memref<1x128xf32, #tpu.memory_space<vmem>>, vector<1x128xf32>
    %cst_49 = arith.constant dense<0.000000e+00> : vector<8x128xf32>
    %51 = tpu.matmul %46, %47, %cst_49 {dimension_numbers = #tpu.dot_dimension_numbers<[1], [0], [0], [1], [0, 0, 1, 1], [], []>} : vector<8x128xf32>, vector<128x128xf32>, vector<8x128xf32> -> vector<8x128xf32>
    %52 = vector.broadcast %48 : vector<1x128xf32> to vector<8x128xf32>
    %53 = arith.addf %51, %52 : vector<8x128xf32>
    %cst_50 = arith.constant 0.000000e+00 : f32
    %54 = vector.broadcast %cst_50 : f32 to vector<8x128xf32>
    %55 = arith.maximumf %53, %54 : vector<8x128xf32>
    %cst_51 = arith.constant dense<0.000000e+00> : vector<8x128xf32>
    %56 = tpu.matmul %55, %49, %cst_51 {dimension_numbers = #tpu.dot_dimension_numbers<[1], [0], [0], [1], [0, 0, 1, 1], [], []>} : vector<8x128xf32>, vector<128x128xf32>, vector<8x128xf32> -> vector<8x128xf32>
    %57 = vector.broadcast %50 : vector<1x128xf32> to vector<8x128xf32>
    %58 = arith.addf %56, %57 : vector<8x128xf32>
    %c0_52 = arith.constant 0 : index
    %c0_53 = arith.constant 0 : index
    %59 = vector.load %arg18[%c0_52, %c0_53] : memref<8x128xf32, #tpu.memory_space<vmem>>, vector<8x128xf32>
    tpu.vector_store %arg18[%c0_52, %c0_53], %58 {strides = array<i32>} : memref<8x128xf32, #tpu.memory_space<vmem>>, vector<8x128xf32>,
    return
  }
}

</mosaic_0001>

<bundles_post_ra>
// kernel: tpu_custom_call.1
= control target key start
LH: loop header
LB: loop body
LE: loop exit
PB: predicated region body
PF: predicated region fallthrough
CT: control target
= control target key end

     0   :  { %s2229_s0 = inlined_call_operand.hbm [shape: f32[8,8], index: 0, kind: input, shape index: {}]   ;;  %s2230_s1 = inlined_call_operand.hbm [shape: f32[8,128], index: 1, kind: input, shape index: {}]   ;;  %s2231_s2 = inlined_call_operand.hbm [shape: f32[128,128], index: 2, kind: input, shape index: {}]   ;;  %s2232_s3 = inlined_call_operand.vmem [shape: f32[1,128], index: 3, kind: input, shape index: {}]   ;;  %s2233_s4 = inlined_call_operand.hbm [shape: f32[128,128], index: 4, kind: input, shape index: {}]   ;;  %s2234_s5 = inlined_call_operand.vmem [shape: f32[1,128], index: 5, kind: input, shape index: {}]   ;;  %s2235_s6 = inlined_call_operand.hbm [shape: f32[128,128], index: 6, kind: input, shape index: {}]   ;;  %s2236_s7 = inlined_call_operand.vmem [shape: f32[1,128], index: 7, kind: input, shape index: {}]   ;;  %s2237_s8 = inlined_call_operand.hbm [shape: f32[128,128], index: 8, kind: input, shape index: {}]   ;;  %s2238_s9 = inlined_call_operand.vmem [shape: f32[1,128], index: 9, kind: input, shape index: {}]   ;;  %s2239_s10 = inlined_call_operand.hbm [shape: f32[128,128], index: 10, kind: input, shape index: {}]   ;;  %s2240_s11 = inlined_call_operand.vmem [shape: f32[1,128], index: 11, kind: input, shape index: {}]   ;;  %s2241_s12 = inlined_call_operand.hbm [shape: f32[128,128], index: 12, kind: input, shape index: {}]   ;;  %s2242_s13 = inlined_call_operand.vmem [shape: f32[1,128], index: 13, kind: input, shape index: {}]   ;;  %s2243_s14 = inlined_call_operand.hbm [shape: f32[128,128], index: 14, kind: input, shape index: {}]   ;;  %s2244_s15 = inlined_call_operand.vmem [shape: f32[1,128], index: 15, kind: input, shape index: {}]   ;;  %s2245_s16 = inlined_call_operand.hbm [shape: f32[128,128], index: 16, kind: input, shape index: {}]   ;;  %s2246_s17 = inlined_call_operand.vmem [shape: f32[1,128], index: 17, kind: input, shape index: {}]   ;;  %s2247_s18 = inlined_call_operand.hbm [shape: f32[8,128], index: 18, kind: output, shape index: {}]  }
   0x1   :  { %2248 = sst [smem:[#allocation27_spill]] %s2229_s0 }
   0x2   :  { %2249 = sst [smem:[#allocation28_spill]] %s2230_s1 }
   0x3   :  { %2250 = sst [smem:[#allocation29_spill]] %s2231_s2 }
   0x4   :  { %23 = vsyncpa [#allocation3], 0 }
   0x5   :  { %24 = vsyncpa [#allocation6], 0 }
   0x6   :  { %25 = vsyncpa [#allocation9], 0 }
   0x7   :  { %26 = vsyncpa [#allocation12], 0 }
   0x8   :  { %27 = vsyncpa [#allocation15], 0 }
   0x9   :  { %28 = vsyncpa [#allocation18], 0 }
   0xa   :  { %29 = vsyncpa [#allocation4], 0  ;;  %s1877_s27 = smov [#allocation5]  }
   0xb   :  { %s46_s28 = sshll.u32 %s1877_s27, 4  ;;  %s47_s28 = int_to_ptr.vmem [resolvable:$true] %s46_s28 }
   0xc   :  { %s1651_s29 = scalar_lea.vmem %s47_s28, 128  ;;  %p1656_p1 = scmp.lt.s32.totalorder %s47_s28, %s47_s28 }
   0xd   :  { %p1652_p0 = scmp.ne.s32.totalorder %s47_s28, %s1651_s29  ;;  %p1657_p2 = scmp.lt.s32.totalorder %s1651_s29, %s1651_s29 }
   0xf   :  { %p1658_p3 = por %p1657_p2, %p1656_p1 }
  0x11   :  { %p1659_p4 = pnand %p1658_p3, %p1652_p0 }
  0x13   :  { %1662 = shalt.err (!%p1659_p4)
}
  0x14   :  { %s2251_s19 = sld [smem:[#allocation28_spill]]  ;;  %s1878_s1 = smov [#allocation8]  }
  0x15   :  { %s69_s20 = sshll.u32 %s1878_s1, 4  ;;  %s1879_s21 = smov [#allocation11]   ;;  %s70_s20 = int_to_ptr.vmem [resolvable:$true] %s69_s20 }
  0x16   :  { %s97_s22 = sshll.u32 %s1879_s21, 4  ;;  %s1671_s2 = scalar_lea.vmem %s70_s20, 2048  ;;  %s98_s22 = int_to_ptr.vmem [resolvable:$true] %s97_s22 }
  0x17   :  { %p1672_p5 = scmp.ne.s32.totalorder %s70_s20, %s1671_s2  ;;  %p1676_p6 = scmp.lt.s32.totalorder %s70_s20, %s70_s20 }
  0x18   :  { %p1677_p7 = scmp.lt.s32.totalorder %s1671_s2, %s1671_s2 }
  0x1a   :  { %49 = dma.hbm_to_vmem [thread:$0]  %s2251_s19, 128, %s47_s28, [#allocation6]  }
  0x1b   :  { %p1678_p8 = por %p1677_p7, %p1676_p6 }
  0x1d   :  { %p1679_p9 = pnand %p1678_p8, %p1672_p5 }
  0x1f   :  { %1682 = shalt.err (!%p1679_p9)
}
  0x20   :  { %s1880_s23 = smov 128   ;;  %s1881_s24 = smov 8  }
  0x21   :  { %75 = dma.hbm_to_vmem [thread:$0]  %s2233_s4, 2048, %s70_s20, [#allocation9], %s1880_s23, %s1880_s23, %s1881_s24  }
  0x22   :  { %s1691_s27 = scalar_lea.vmem %s98_s22, 2048  ;;  %p1696_p11 = scmp.lt.s32.totalorder %s98_s22, %s98_s22 }
  0x23   :  { %p1692_p10 = scmp.ne.s32.totalorder %s98_s22, %s1691_s27  ;;  %p1697_p12 = scmp.lt.s32.totalorder %s1691_s27, %s1691_s27 }
  0x25   :  { %p1698_p13 = por %p1697_p12, %p1696_p11 }
  0x27   :  { %p1699_p0 = pnand %p1698_p13, %p1692_p10 }
  0x29   :  { %1702 = shalt.err (!%p1699_p0)
}
  0x2a   :  { %103 = dma.hbm_to_vmem [thread:$0]  %s2237_s8, 2048, %s98_s22, [#allocation12], %s1880_s23, %s1880_s23, %s1881_s24  }
  0x2b   :  { %s1882_s30 = smov [#allocation14]   ;;  %s1883_s19 = smov [#allocation2]  }
  0x2c   :  { %s125_s0 = sshll.u32 %s1882_s30, 4  ;;  %s36_s4 = sshll.u32 %s1883_s19, 4  ;;  %s126_s0 = int_to_ptr.vmem [resolvable:$true] %s125_s0  ;;  %s37_s4 = int_to_ptr.vmem [resolvable:$true] %s36_s4 }
  0x2d   :  { %s1711_s1 = scalar_lea.vmem %s126_s0, 2048  ;;  %p1716_p2 = scmp.lt.s32.totalorder %s126_s0, %s126_s0 }
  0x2e   :  { %p1712_p1 = scmp.ne.s32.totalorder %s126_s0, %s1711_s1  ;;  %p1717_p3 = scmp.lt.s32.totalorder %s1711_s1, %s1711_s1 }
  0x30   :  { %p1718_p4 = por %p1717_p3, %p1716_p2 }
  0x32   :  { %p1719_p5 = pnand %p1718_p4, %p1712_p1 }
  0x34   :  { %1722 = shalt.err (!%p1719_p5)
}
  0x35   :  { %131 = dma.hbm_to_vmem [thread:$0]  %s2241_s12, 2048, %s126_s0, [#allocation15], %s1880_s23, %s1880_s23, %s1881_s24  }
  0x36   :  { %s1731_s8 = scalar_lea.vmem %s37_s4, 128  ;;  %p1736_p7 = scmp.lt.s32.totalorder %s37_s4, %s37_s4 }
  0x37   :  { %p1732_p6 = scmp.ne.s32.totalorder %s37_s4, %s1731_s8  ;;  %p1737_p8 = scmp.lt.s32.totalorder %s1731_s8, %s1731_s8 }
  0x39   :  { %p1738_p9 = por %p1737_p8, %p1736_p7 }
  0x3b   :  { %p1739_p10 = pnand %p1738_p9, %p1732_p6 }
  0x3d   :  { %1742 = shalt.err (!%p1739_p10)
}
  0x3e   :  { %s2252_s25 = sld [smem:[#allocation27_spill]]  ;;  %s1884_s26 = smov [#allocation7]  }
  0x3f   :  { %s55_s27 = sshll.u32 %s1884_s26, 4  ;;  %s1885_s28 = smov [#allocation10]   ;;  %s56_s27 = int_to_ptr.vmem [resolvable:$true] %s55_s27 }
  0x40   :  { %s83_s29 = sshll.u32 %s1885_s28, 4  ;;  %s1751_s30 = scalar_lea.vmem %s56_s27, 2048  ;;  %s84_s29 = int_to_ptr.vmem [resolvable:$true] %s83_s29 }
  0x41   :  { %p1752_p11 = scmp.ne.s32.totalorder %s56_s27, %s1751_s30  ;;  %p1756_p12 = scmp.lt.s32.totalorder %s56_s27, %s56_s27 }
  0x42   :  { %p1757_p13 = scmp.lt.s32.totalorder %s1751_s30, %s1751_s30 }
  0x44   :  { %39 = dma.hbm_to_vmem [thread:$0]  %s2252_s25, 128, %s37_s4, [#allocation3]  }
  0x45   :  { %p1758_p0 = por %p1757_p13, %p1756_p12 }
  0x47   :  { %p1759_p1 = pnand %p1758_p0, %p1752_p11 }
  0x49   :  { %1762 = shalt.err (!%p1759_p1)
}
  0x4a   :  { %s2253_s19 = sld [smem:[#allocation29_spill]]  ;;  %s1771_s4 = scalar_lea.vmem %s84_s29, 2048 }
  0x4b   :  { %p1772_p2 = scmp.ne.s32.totalorder %s84_s29, %s1771_s4  ;;  %p1776_p3 = scmp.lt.s32.totalorder %s84_s29, %s84_s29 }
  0x4c   :  { %p1777_p4 = scmp.lt.s32.totalorder %s1771_s4, %s1771_s4 }
  0x4e   :  { %p1778_p5 = por %p1777_p4, %p1776_p3 }
  0x50   :  { %61 = dma.hbm_to_vmem [thread:$0]  %s2253_s19, 2048, %s56_s27, [#allocation6], %s1880_s23, %s1880_s23, %s1881_s24  }
  0x51   :  { %p1779_p6 = pnand %p1778_p5, %p1772_p2 }
  0x53   :  { %1782 = shalt.err (!%p1779_p6)
}
  0x54   :  { %89 = dma.hbm_to_vmem [thread:$0]  %s2235_s6, 2048, %s84_s29, [#allocation9], %s1880_s23, %s1880_s23, %s1881_s24  }
  0x55   :  { %s1886_s21 = smov [#allocation13]   ;;  %s1887_s22 = smov [#allocation16]  }
  0x56   :  { %s111_s8 = sshll.u32 %s1886_s21, 4  ;;  %s139_s2 = sshll.u32 %s1887_s22, 4  ;;  %s112_s8 = int_to_ptr.vmem [resolvable:$true] %s111_s8  ;;  %s140_s2 = int_to_ptr.vmem [resolvable:$true] %s139_s2 }
  0x57   :  { %s1791_s25 = scalar_lea.vmem %s112_s8, 2048  ;;  %p1796_p8 = scmp.lt.s32.totalorder %s112_s8, %s112_s8 }
  0x58   :  { %p1792_p7 = scmp.ne.s32.totalorder %s112_s8, %s1791_s25  ;;  %p1797_p9 = scmp.lt.s32.totalorder %s1791_s25, %s1791_s25 }
  0x5a   :  { %p1798_p10 = por %p1797_p9, %p1796_p8 }
  0x5c   :  { %p1799_p11 = pnand %p1798_p10, %p1792_p7 }
  0x5e   :  { %1802 = shalt.err (!%p1799_p11)
}
  0x5f   :  { %117 = dma.hbm_to_vmem [thread:$0]  %s2239_s10, 2048, %s112_s8, [#allocation12], %s1880_s23, %s1880_s23, %s1881_s24  }
  0x60   :  { %s1811_s6 = scalar_lea.vmem %s140_s2, 2048  ;;  %p1816_p13 = scmp.lt.s32.totalorder %s140_s2, %s140_s2 }
  0x61   :  { %p1812_p12 = scmp.ne.s32.totalorder %s140_s2, %s1811_s6  ;;  %p1817_p0 = scmp.lt.s32.totalorder %s1811_s6, %s1811_s6 }
  0x63   :  { %p1818_p1 = por %p1817_p0, %p1816_p13 }
  0x65   :  { %p1819_p2 = pnand %p1818_p1, %p1812_p12 }
  0x67   :  { %1822 = shalt.err (!%p1819_p2)
}
  0x68   :  { %145 = dma.hbm_to_vmem [thread:$0]  %s2243_s14, 2048, %s140_s2, [#allocation15], %s1880_s23, %s1880_s23, %s1881_s24  }
  0x69   :  { %s1888_s30 = smov [#allocation17]  }
  0x6a   :  { %s153_s12 = sshll.u32 %s1888_s30, 4  ;;  %s154_s12 = int_to_ptr.vmem [resolvable:$true] %s153_s12 }
  0x6b   :  { %s1831_s0 = scalar_lea.vmem %s154_s12, 2048  ;;  %p1836_p4 = scmp.lt.s32.totalorder %s154_s12, %s154_s12 }
  0x6c   :  { %p1832_p3 = scmp.ne.s32.totalorder %s154_s12, %s1831_s0  ;;  %p1837_p5 = scmp.lt.s32.totalorder %s1831_s0, %s1831_s0 }
  0x6e   :  { %p1838_p6 = por %p1837_p5, %p1836_p4 }
  0x70   :  { %p1839_p7 = pnand %p1838_p6, %p1832_p3 }
  0x72   :  { %1842 = shalt.err (!%p1839_p7)
}
  0x73   :  { %159 = dma.hbm_to_vmem [thread:$0]  %s2245_s16, 2048, %s154_s12, [#allocation18], %s1880_s23, %s1880_s23, %s1881_s24  }
  0x74   :  { %1863 = dma.done.wait [#allocation3], 128  }
  0x75   :  { %1864 = vsyncadd [#allocation3], 4294967168 }
  0x76   :  { %1865 = dma.done.wait [#allocation6], 2176  }
  0x77   :  { %1866 = vsyncadd [#allocation6], 4294965120 }
  0x78   :  { %1867 = dma.done.wait [#allocation9], 4096  }
  0x79   :  { %1868 = vsyncadd [#allocation9], 4294963200 }
  0x7a   :  { %1869 = dma.done.wait [#allocation12], 4096  }
  0x7b   :  { %1870 = vsyncadd [#allocation12], 4294963200 }
  0x7c   :  { %1871 = dma.done.wait [#allocation15], 4096  }
  0x7d   :  { %1872 = vsyncadd [#allocation15], 4294963200 }
  0x7e   :  { %1873 = dma.done.wait [#allocation18], 2048  }
  0x7f   :  { %1874 = vsyncadd [#allocation18], 4294965248  ;;  %v1889_v0 = vmov 0.0   ;;  %vm1890_vm0 = vmmov 0   ;;  %vm228_vm1 = vcmask 64512   ;;  %v193_v1 = vld [vmem:[#allocation5] sm:$0xff] }
  0x80   :  { %1333 = vmatprep.subr.mxu0 %v1889_v0  ;;  %1335 = vmatprep.mubr.msk.f32.mxu0 %vm1890_vm0, %v1889_v0  ;;  %v2047_v2 = vld [vmem:[#allocation2] sm:$0xff]  ;;  %v209_v3 = vld [vmem:[#allocation7 + $0x78] sm:$0xff]  ;;  %v207_v5 = vld [vmem:[#allocation7 + $0x68] sm:$0xff]  ;;  %s1891_s2 = smov [#allocation19]  }
  0x81   :  { %1338 = vmatprep.subr.mxu1 %v1889_v0  ;;  %1370 = vmatprep.mubr.msk.f32.mxu1 %vm1890_vm0, %v1889_v0  ;;  %v208_v4 = vld [vmem:[#allocation7 + $0x70] sm:$0xff]  ;;  %v206_v6 = vld [vmem:[#allocation7 + $0x60] sm:$0xff]  ;;  %v205_v7 = vld [vmem:[#allocation7 + $0x58] sm:$0xff]  ;;  %s1166_s25 = sshll.u32 %s1891_s2, 4  ;;  %s1167_s25 = int_to_ptr.vmem [resolvable:$true] %s1166_s25 }
  0x82   :  { %1334 = vmatpush3.msra.mxu0 %v193_v1  ;;  %1339 = vmatpush3.msra.mxu1 %v209_v3  ;;  %v204_v8 = vld [vmem:[#allocation7 + $0x50] sm:$0xff]  ;;  %v203_v9 = vld [vmem:[#allocation7 + $0x48] sm:$0xff]  ;;  %v202_v10 = vld [vmem:[#allocation7 + $0x40] sm:$0xff]  ;;  %s1843_s26 = scalar_lea.vmem %s1167_s25, 128  ;;  %p1848_p9 = scmp.lt.s32.totalorder %s1167_s25, %s1167_s25 }
  0x83   :  { %1336 = vmatmul.mubr.msk.f32.vlgmr.msra.gmra.mxu0 %vm228_vm1, %v2047_v2  ;;  %1340 = vmatprep.subr.mxu1 %v1889_v0  ;;  %v201_v11 = vld [vmem:[#allocation7 + $0x38] sm:$0xff]  ;;  %v200_v12 = vld [vmem:[#allocation7 + $0x30] sm:$0xff]  ;;  %v199_v13 = vld [vmem:[#allocation7 + $0x28] sm:$0xff]  ;;  %p1844_p8 = scmp.ne.s32.totalorder %s1167_s25, %s1843_s26  ;;  %p1849_p10 = scmp.lt.s32.totalorder %s1843_s26, %s1843_s26 }
  0x84   :  { %1341 = vmatpush3.msra.mxu1 %v208_v4  ;;  %1373 = vmatprep.subr.mxu0 %v1889_v0  ;;  %v198_v14 = vld [vmem:[#allocation7 + $0x20] sm:$0xff]  ;;  %v197_v15 = vld [vmem:[#allocation7 + $0x18] sm:$0xff]  ;;  %v196_v16 = vld [vmem:[#allocation7 + $0x10] sm:$0xff] }
  0x85   :  { %1342 = vmatprep.subr.mxu1 %v1889_v0  ;;  %1405 = vmatprep.mubr.msk.f32.mxu0 %vm1890_vm0, %v1889_v0  ;;  %v195_v17 = vld [vmem:[#allocation7 + $0x8] sm:$0xff]  ;;  %v194_v18 = vld [vmem:[#allocation7] sm:$0xff]  ;;  %v226_v19 = vld [vmem:[#allocation8 + $0x78] sm:$0xff]  ;;  %p1850_p11 = por %p1849_p10, %p1848_p9 }
  0x86   :  { %1343 = vmatpush3.msra.mxu1 %v207_v5  ;;  %v225_v20 = vld [vmem:[#allocation8 + $0x70] sm:$0xff]  ;;  %1374 = vmatpush3.msra.mxu0 %v226_v19  ;;  %v224_v21 = vld [vmem:[#allocation8 + $0x68] sm:$0xff]  ;;  %v223_v22 = vld [vmem:[#allocation8 + $0x60] sm:$0xff] }
  0x87   :  { %1344 = vmatprep.subr.mxu1 %v1889_v0  ;;  %1375 = vmatprep.subr.mxu0 %v1889_v0  ;;  %v222_v23 = vld [vmem:[#allocation8 + $0x58] sm:$0xff]  ;;  %v221_v24 = vld [vmem:[#allocation8 + $0x50] sm:$0xff]  ;;  %v220_v25 = vld [vmem:[#allocation8 + $0x48] sm:$0xff]  ;;  %p1851_p12 = pnand %p1850_p11, %p1844_p8 }
  0x88   :  { %1345 = vmatpush3.msra.mxu1 %v206_v6  ;;  %1376 = vmatpush3.msra.mxu0 %v225_v20  ;;  %v219_v26 = vld [vmem:[#allocation8 + $0x40] sm:$0xff]  ;;  %v218_v27 = vld [vmem:[#allocation8 + $0x38] sm:$0xff]  ;;  %v217_v28 = vld [vmem:[#allocation8 + $0x30] sm:$0xff] }
  0x89   :  { %1346 = vmatprep.subr.mxu1 %v1889_v0  ;;  %1377 = vmatprep.subr.mxu0 %v1889_v0  ;;  %v216_v29 = vld [vmem:[#allocation8 + $0x28] sm:$0xff]  ;;  %v215_v30 = vld [vmem:[#allocation8 + $0x20] sm:$0xff]  ;;  %v214_v31 = vld [vmem:[#allocation8 + $0x18] sm:$0xff] }
  0x8a   :  { %1347 = vmatpush3.msra.mxu1 %v205_v7  ;;  %1378 = vmatpush3.msra.mxu0 %v224_v21  ;;  %v213_v34 = vld [vmem:[#allocation8 + $0x10] sm:$0xff]  ;;  %v212_v35 = vld [vmem:[#allocation8 + $0x8] sm:$0xff]  ;;  %v211_v36 = vld [vmem:[#allocation8] sm:$0xff] }
  0x8b   :  { %1348 = vmatprep.subr.mxu1 %v1889_v0  ;;  %1379 = vmatprep.subr.mxu0 %v1889_v0  ;;  %v1181_v37 = vld [vmem:[%s2232_s3] ss:$0 sm:$0xff]  ;;  %v471_v42 = vld [vmem:[#allocation10 + $0x78] sm:$0xff]  ;;  %v469_v44 = vld [vmem:[#allocation10 + $0x68] sm:$0xff] }
  0x8c   :  { %1349 = vmatpush3.msra.mxu1 %v204_v8  ;;  %1380 = vmatpush3.msra.mxu0 %v223_v22  ;;  %v470_v43 = vld [vmem:[#allocation10 + $0x70] sm:$0xff]  ;;  %v468_v45 = vld [vmem:[#allocation10 + $0x60] sm:$0xff]  ;;  %v467_v46 = vld [vmem:[#allocation10 + $0x58] sm:$0xff] }
  0x8d   :  { %1350 = vmatprep.subr.mxu1 %v1889_v0  ;;  %1381 = vmatprep.subr.mxu0 %v1889_v0  ;;  %v466_v47 = vld [vmem:[#allocation10 + $0x50] sm:$0xff]  ;;  %v465_v48 = vld [vmem:[#allocation10 + $0x48] sm:$0xff]  ;;  %v464_v49 = vld [vmem:[#allocation10 + $0x40] sm:$0xff] }
  0x8e   :  { %1351 = vmatpush3.msra.mxu1 %v203_v9  ;;  %1382 = vmatpush3.msra.mxu0 %v222_v23  ;;  %v463_v50 = vld [vmem:[#allocation10 + $0x38] sm:$0xff]  ;;  %v462_v51 = vld [vmem:[#allocation10 + $0x30] sm:$0xff]  ;;  %v461_v52 = vld [vmem:[#allocation10 + $0x28] sm:$0xff] }
  0x8f   :  { %1352 = vmatprep.subr.mxu1 %v1889_v0  ;;  %1383 = vmatprep.subr.mxu0 %v1889_v0  ;;  %v460_v53 = vld [vmem:[#allocation10 + $0x20] sm:$0xff]  ;;  %v459_v54 = vld [vmem:[#allocation10 + $0x18] sm:$0xff]  ;;  %v458_v55 = vld [vmem:[#allocation10 + $0x10] sm:$0xff] }
  0x90   :  { %1353 = vmatpush3.msra.mxu1 %v202_v10  ;;  %1384 = vmatpush3.msra.mxu0 %v221_v24  ;;  %v457_v56 = vld [vmem:[#allocation10 + $0x8] sm:$0xff]  ;;  %v1182_v57 = vld [vmem:[%s2234_s5] ss:$0 sm:$0xff]  ;;  %v456_v62 = vld [vmem:[#allocation10] sm:$0xff] }
  0x91   :  { %1354 = vmatprep.subr.mxu1 %v1889_v0  ;;  %1385 = vmatprep.subr.mxu0 %v1889_v0  ;;  %v488_v63 = vld [vmem:[#allocation11 + $0x78] sm:$0xff]  ;;  %v487_v1 = vld [vmem:[#allocation11 + $0x70] sm:$0xff]  ;;  %v486_v3 = vld [vmem:[#allocation11 + $0x68] sm:$0xff] }
  0x92   :  { %1355 = vmatpush3.msra.mxu1 %v201_v11  ;;  %1386 = vmatpush3.msra.mxu0 %v220_v25  ;;  %v485_v4 = vld [vmem:[#allocation11 + $0x60] sm:$0xff]  ;;  %v484_v5 = vld [vmem:[#allocation11 + $0x58] sm:$0xff]  ;;  %v483_v6 = vld [vmem:[#allocation11 + $0x50] sm:$0xff] }
  0x93   :  { %1356 = vmatprep.subr.mxu1 %v1889_v0  ;;  %1387 = vmatprep.subr.mxu0 %v1889_v0  ;;  %v482_v7 = vld [vmem:[#allocation11 + $0x48] sm:$0xff]  ;;  %v481_v8 = vld [vmem:[#allocation11 + $0x40] sm:$0xff]  ;;  %v480_v9 = vld [vmem:[#allocation11 + $0x38] sm:$0xff] }
  0x94   :  { %1357 = vmatpush3.msra.mxu1 %v200_v12  ;;  %1388 = vmatpush3.msra.mxu0 %v219_v26  ;;  %v479_v10 = vld [vmem:[#allocation11 + $0x30] sm:$0xff]  ;;  %v478_v11 = vld [vmem:[#allocation11 + $0x28] sm:$0xff]  ;;  %v477_v12 = vld [vmem:[#allocation11 + $0x20] sm:$0xff] }
  0x95   :  { %1358 = vmatprep.subr.mxu1 %v1889_v0  ;;  %1389 = vmatprep.subr.mxu0 %v1889_v0  ;;  %v1184_v19 = vld [vmem:[%s2236_s7] ss:$0 sm:$0xff]  ;;  %v729_v24 = vld [vmem:[#allocation13 + $0x78] sm:$0xff]  ;;  %v727_v26 = vld [vmem:[#allocation13 + $0x68] sm:$0xff] }
  0x96   :  { %1359 = vmatpush3.msra.mxu1 %v199_v13  ;;  %1390 = vmatpush3.msra.mxu0 %v218_v27  ;;  %v476_v13 = vld [vmem:[#allocation11 + $0x18] sm:$0xff]  ;;  %v728_v25 = vld [vmem:[#allocation13 + $0x70] sm:$0xff]  ;;  %v726_v27 = vld [vmem:[#allocation13 + $0x60] sm:$0xff] }
  0x97   :  { %1360 = vmatprep.subr.mxu1 %v1889_v0  ;;  %1391 = vmatprep.subr.mxu0 %v1889_v0 }
  0x98   :  { %1361 = vmatpush3.msra.mxu1 %v198_v14  ;;  %1392 = vmatpush3.msra.mxu0 %v217_v28  ;;  %v725_v28 = vld [vmem:[#allocation13 + $0x58] sm:$0xff] }
  0x99   :  { %1362 = vmatprep.subr.mxu1 %v1889_v0  ;;  %1393 = vmatprep.subr.mxu0 %v1889_v0 }
  0x9a   :  { %1363 = vmatpush3.msra.mxu1 %v197_v15  ;;  %1394 = vmatpush3.msra.mxu0 %v216_v29  ;;  %v724_v29 = vld [vmem:[#allocation13 + $0x50] sm:$0xff] }
  0x9b   :  { %1364 = vmatprep.subr.mxu1 %v1889_v0  ;;  %1395 = vmatprep.subr.mxu0 %v1889_v0 }
  0x9c   :  { %1365 = vmatpush3.msra.mxu1 %v196_v16  ;;  %1396 = vmatpush3.msra.mxu0 %v215_v30  ;;  %v475_v16 = vld [vmem:[#allocation11 + $0x10] sm:$0xff]  ;;  %v723_v30 = vld [vmem:[#allocation13 + $0x48] sm:$0xff] }
  0x9d   :  { %1366 = vmatprep.subr.mxu1 %v1889_v0  ;;  %1397 = vmatprep.subr.mxu0 %v1889_v0 }
  0x9e   :  { %1367 = vmatpush3.msra.mxu1 %v195_v17  ;;  %1398 = vmatpush3.msra.mxu0 %v214_v31  ;;  %v474_v17 = vld [vmem:[#allocation11 + $0x8] sm:$0xff]  ;;  %v722_v31 = vld [vmem:[#allocation13 + $0x40] sm:$0xff] }
  0x9f   :  { %1368 = vmatprep.subr.mxu1 %v1889_v0  ;;  %1399 = vmatprep.subr.mxu0 %v1889_v0 }
  0xa0   :  { %1369 = vmatpush3.msra.mxu1 %v194_v18  ;;  %1400 = vmatpush3.msra.mxu0 %v213_v34  ;;  %v473_v18 = vld [vmem:[#allocation11] sm:$0xff]  ;;  %v719_v34 = vld [vmem:[#allocation13 + $0x28] sm:$0xff] }
  0xa1   :  { %1408 = vmatprep.subr.mxu1 %v1889_v0  ;;  %1401 = vmatprep.subr.mxu0 %v1889_v0 }
  0xa2   :  { %1402 = vmatpush3.msra.mxu0 %v212_v35  ;;  %v718_v35 = vld [vmem:[#allocation13 + $0x20] sm:$0xff] }
  0xa3   :  { %1403 = vmatprep.subr.mxu0 %v1889_v0 }
  0xa4   :  { %1404 = vmatpush3.msra.mxu0 %v211_v36  ;;  %v717_v36 = vld [vmem:[#allocation13 + $0x18] sm:$0xff] }
  0xa5   :  { %1413 = vmatprep.subr.mxu0 %v1889_v0 }
 0x143   :  { %v298_v32 = vpop.f32.mrf.mxu0 }
 0x144   :  { %1371 = vmatmul.mubr.f32.vlgmr.msra.gmra.mxu1 %v298_v32  ;;  %v721_v32 = vld [vmem:[#allocation13 + $0x38] sm:$0xff] }
 0x145   :  { %v1337_v33 = vpop.f32.mrf.mxu0  ;;  %1410 = vmatprep.mubr.msk.f32.mxu1 %vm1890_vm0, %v1889_v0 }
 0x146   :  { %v720_v33 = vld [vmem:[#allocation13 + $0x30] sm:$0xff] }
 0x204   :  { %v374_v38 = vpop.f32.mrf.mxu1 }
 0x205   :  { %v375_v39 = vadd.f32 %v1181_v37, %v374_v38  ;;  %v716_v37 = vld [vmem:[#allocation13 + $0x10] sm:$0xff]  ;;  %v715_v38 = vld [vmem:[#allocation13 + $0x8] sm:$0xff] }
 0x206   :  { %v1372_v40 = vpop.f32.mrf.mxu1 }
 0x207   :  { %v378_v41 = vmax.f32 %v375_v39, 0.0  ;;  %v1185_v39 = vld [vmem:[%s2238_s9] ss:$0 sm:$0xff] }
 0x209   :  { %1406 = vmatmul.mubr.f32.vlgmr.msra.gmra.mxu0 %v378_v41 }
 0x20a   :  { %1445 = vmatprep.mubr.msk.f32.mxu0 %vm1890_vm0, %v1889_v0  ;;  %1414 = vmatpush3.msra.mxu0 %v471_v42 }
 0x20b   :  { %1415 = vmatprep.subr.mxu0 %v1889_v0 }
 0x20c   :  { %1416 = vmatpush3.msra.mxu0 %v470_v43 }
 0x20d   :  { %1417 = vmatprep.subr.mxu0 %v1889_v0 }
 0x20e   :  { %1418 = vmatpush3.msra.mxu0 %v469_v44  ;;  %v714_v44 = vld [vmem:[#allocation13] sm:$0xff] }
 0x20f   :  { %1419 = vmatprep.subr.mxu0 %v1889_v0 }
 0x210   :  { %1420 = vmatpush3.msra.mxu0 %v468_v45  ;;  %v746_v45 = vld [vmem:[#allocation14 + $0x78] sm:$0xff] }
 0x211   :  { %1421 = vmatprep.subr.mxu0 %v1889_v0 }
 0x212   :  { %1422 = vmatpush3.msra.mxu0 %v467_v46  ;;  %v745_v46 = vld [vmem:[#allocation14 + $0x70] sm:$0xff] }
 0x213   :  { %1423 = vmatprep.subr.mxu0 %v1889_v0 }
 0x214   :  { %1424 = vmatpush3.msra.mxu0 %v466_v47  ;;  %v744_v47 = vld [vmem:[#allocation14 + $0x68] sm:$0xff] }
 0x215   :  { %1425 = vmatprep.subr.mxu0 %v1889_v0 }
 0x216   :  { %1426 = vmatpush3.msra.mxu0 %v465_v48  ;;  %v743_v48 = vld [vmem:[#allocation14 + $0x60] sm:$0xff] }
 0x217   :  { %1427 = vmatprep.subr.mxu0 %v1889_v0 }
 0x218   :  { %1428 = vmatpush3.msra.mxu0 %v464_v49  ;;  %v741_v49 = vld [vmem:[#allocation14 + $0x50] sm:$0xff] }
 0x219   :  { %1429 = vmatprep.subr.mxu0 %v1889_v0 }
 0x21a   :  { %1430 = vmatpush3.msra.mxu0 %v463_v50  ;;  %v740_v50 = vld [vmem:[#allocation14 + $0x48] sm:$0xff] }
 0x21b   :  { %1431 = vmatprep.subr.mxu0 %v1889_v0 }
 0x21c   :  { %1432 = vmatpush3.msra.mxu0 %v462_v51  ;;  %v739_v51 = vld [vmem:[#allocation14 + $0x40] sm:$0xff] }
 0x21d   :  { %1433 = vmatprep.subr.mxu0 %v1889_v0 }
 0x21e   :  { %1434 = vmatpush3.msra.mxu0 %v461_v52  ;;  %v738_v52 = vld [vmem:[#allocation14 + $0x38] sm:$0xff] }
 0x21f   :  { %1435 = vmatprep.subr.mxu0 %v1889_v0 }
 0x220   :  { %1436 = vmatpush3.msra.mxu0 %v460_v53  ;;  %v737_v53 = vld [vmem:[#allocation14 + $0x30] sm:$0xff] }
 0x221   :  { %1437 = vmatprep.subr.mxu0 %v1889_v0 }
 0x222   :  { %1438 = vmatpush3.msra.mxu0 %v459_v54  ;;  %v736_v54 = vld [vmem:[#allocation14 + $0x28] sm:$0xff] }
 0x223   :  { %1439 = vmatprep.subr.mxu0 %v1889_v0 }
 0x224   :  { %1440 = vmatpush3.msra.mxu0 %v458_v55  ;;  %v735_v55 = vld [vmem:[#allocation14 + $0x20] sm:$0xff] }
 0x225   :  { %1441 = vmatprep.subr.mxu0 %v1889_v0 }
 0x226   :  { %1442 = vmatpush3.msra.mxu0 %v457_v56  ;;  %v734_v56 = vld [vmem:[#allocation14 + $0x18] sm:$0xff] }
 0x227   :  { %1443 = vmatprep.subr.mxu0 %v1889_v0 }
 0x228   :  { %1444 = vmatpush3.msra.mxu0 %v456_v62  ;;  %v987_v62 = vld [vmem:[#allocation16 + $0x78] sm:$0xff] }
 0x229   :  { %1483 = vmatprep.subr.mxu0 %v1889_v0 }
 0x2c9   :  { %v451_v58 = vpop.f32.mrf.mxu0 }
 0x2ca   :  { %v452_v59 = vadd.f32 %v1182_v57, %v451_v58 }
 0x2cb   :  { %v1407_v60 = vpop.f32.mrf.mxu0 }
 0x2cc   :  { %v455_v61 = vmax.f32 %v452_v59, 0.0  ;;  %v733_v59 = vld [vmem:[#allocation14 + $0x10] sm:$0xff]  ;;  %v732_v60 = vld [vmem:[#allocation14 + $0x8] sm:$0xff] }
 0x2ce   :  { %1409 = vmatpush3.msra.mxu1 %v455_v61  ;;  %v731_v61 = vld [vmem:[#allocation14] sm:$0xff] }
 0x2cf   :  { %1411 = vmatmul.mubr.msk.f32.vlgmr.msra.gmra.mxu1 %vm228_vm1, %v2047_v2  ;;  %1448 = vmatprep.subr.mxu1 %v1889_v0 }
 0x2d0   :  { %1480 = vmatprep.mubr.msk.f32.mxu1 %vm1890_vm0, %v1889_v0  ;;  %1449 = vmatpush3.msra.mxu1 %v488_v63  ;;  %v986_v63 = vld [vmem:[#allocation16 + $0x70] sm:$0xff] }
 0x2d1   :  { %1450 = vmatprep.subr.mxu1 %v1889_v0 }
 0x2d2   :  { %1451 = vmatpush3.msra.mxu1 %v487_v1  ;;  %v985_v1 = vld [vmem:[#allocation16 + $0x68] sm:$0xff] }
 0x2d3   :  { %1452 = vmatprep.subr.mxu1 %v1889_v0 }
 0x2d4   :  { %1453 = vmatpush3.msra.mxu1 %v486_v3  ;;  %v984_v3 = vld [vmem:[#allocation16 + $0x60] sm:$0xff] }
 0x2d5   :  { %1454 = vmatprep.subr.mxu1 %v1889_v0 }
 0x2d6   :  { %1455 = vmatpush3.msra.mxu1 %v485_v4  ;;  %v983_v4 = vld [vmem:[#allocation16 + $0x58] sm:$0xff] }
 0x2d7   :  { %1456 = vmatprep.subr.mxu1 %v1889_v0 }
 0x2d8   :  { %1457 = vmatpush3.msra.mxu1 %v484_v5  ;;  %v982_v5 = vld [vmem:[#allocation16 + $0x50] sm:$0xff] }
 0x2d9   :  { %1458 = vmatprep.subr.mxu1 %v1889_v0 }
 0x2da   :  { %1459 = vmatpush3.msra.mxu1 %v483_v6  ;;  %v981_v6 = vld [vmem:[#allocation16 + $0x48] sm:$0xff] }
 0x2db   :  { %1460 = vmatprep.subr.mxu1 %v1889_v0 }
 0x2dc   :  { %1461 = vmatpush3.msra.mxu1 %v482_v7  ;;  %v980_v7 = vld [vmem:[#allocation16 + $0x40] sm:$0xff] }
 0x2dd   :  { %1462 = vmatprep.subr.mxu1 %v1889_v0 }
 0x2de   :  { %1463 = vmatpush3.msra.mxu1 %v481_v8  ;;  %v979_v8 = vld [vmem:[#allocation16 + $0x38] sm:$0xff] }
 0x2df   :  { %1464 = vmatprep.subr.mxu1 %v1889_v0 }
 0x2e0   :  { %1465 = vmatpush3.msra.mxu1 %v480_v9  ;;  %v978_v9 = vld [vmem:[#allocation16 + $0x30] sm:$0xff] }
 0x2e1   :  { %1466 = vmatprep.subr.mxu1 %v1889_v0 }
 0x2e2   :  { %1467 = vmatpush3.msra.mxu1 %v479_v10  ;;  %v977_v10 = vld [vmem:[#allocation16 + $0x28] sm:$0xff] }
 0x2e3   :  { %1468 = vmatprep.subr.mxu1 %v1889_v0 }
 0x2e4   :  { %1469 = vmatpush3.msra.mxu1 %v478_v11  ;;  %v976_v11 = vld [vmem:[#allocation16 + $0x20] sm:$0xff] }
 0x2e5   :  { %1470 = vmatprep.subr.mxu1 %v1889_v0 }
 0x2e6   :  { %1471 = vmatpush3.msra.mxu1 %v477_v12  ;;  %v975_v12 = vld [vmem:[#allocation16 + $0x18] sm:$0xff] }
 0x2e7   :  { %1472 = vmatprep.subr.mxu1 %v1889_v0 }
 0x2e8   :  { %1473 = vmatpush3.msra.mxu1 %v476_v13  ;;  %v1187_v13 = vld [vmem:[%s2240_s11] ss:$0 sm:$0xff] }
 0x2e9   :  { %1474 = vmatprep.subr.mxu1 %v1889_v0 }
 0x2ea   :  { %1475 = vmatpush3.msra.mxu1 %v475_v16 }
 0x2eb   :  { %1476 = vmatprep.subr.mxu1 %v1889_v0 }
 0x2ec   :  { %1477 = vmatpush3.msra.mxu1 %v474_v17 }
 0x2ed   :  { %1478 = vmatprep.subr.mxu1 %v1889_v0 }
 0x2ee   :  { %1479 = vmatpush3.msra.mxu1 %v473_v18  ;;  %v974_v18 = vld [vmem:[#allocation16 + $0x10] sm:$0xff] }
 0x2ef   :  { %1488 = vmatprep.subr.mxu1 %v1889_v0 }
 0x38f   :  { %v556_v14 = vpop.f32.mrf.mxu1 }
 0x390   :  { %1446 = vmatmul.mubr.f32.vlgmr.msra.gmra.mxu0 %v556_v14 }
 0x391   :  { %v1412_v15 = vpop.f32.mrf.mxu1  ;;  %1485 = vmatprep.mubr.msk.f32.mxu0 %vm1890_vm0, %v1889_v0 }
 0x450   :  { %v632_v20 = vpop.f32.mrf.mxu0 }
 0x451   :  { %v633_v21 = vadd.f32 %v1184_v19, %v632_v20  ;;  %v973_v19 = vld [vmem:[#allocation16 + $0x8] sm:$0xff]  ;;  %v972_v20 = vld [vmem:[#allocation16] sm:$0xff] }
 0x452   :  { %v1447_v22 = vpop.f32.mrf.mxu0 }
 0x453   :  { %v636_v23 = vmax.f32 %v633_v21, 0.0  ;;  %v1004_v21 = vld [vmem:[#allocation17 + $0x78] sm:$0xff]  ;;  %v1003_v22 = vld [vmem:[#allocation17 + $0x70] sm:$0xff] }
 0x455   :  { %1481 = vmatmul.mubr.f32.vlgmr.msra.gmra.mxu1 %v636_v23  ;;  %v1002_v23 = vld [vmem:[#allocation17 + $0x68] sm:$0xff] }
 0x456   :  { %1520 = vmatprep.mubr.msk.f32.mxu1 %vm1890_vm0, %v1889_v0  ;;  %1489 = vmatpush3.msra.mxu1 %v729_v24  ;;  %v1001_v24 = vld [vmem:[#allocation17 + $0x60] sm:$0xff] }
 0x457   :  { %1490 = vmatprep.subr.mxu1 %v1889_v0 }
 0x458   :  { %1491 = vmatpush3.msra.mxu1 %v728_v25  ;;  %v1000_v25 = vld [vmem:[#allocation17 + $0x58] sm:$0xff] }
 0x459   :  { %1492 = vmatprep.subr.mxu1 %v1889_v0 }
 0x45a   :  { %1493 = vmatpush3.msra.mxu1 %v727_v26  ;;  %v999_v26 = vld [vmem:[#allocation17 + $0x50] sm:$0xff] }
 0x45b   :  { %1494 = vmatprep.subr.mxu1 %v1889_v0 }
 0x45c   :  { %1495 = vmatpush3.msra.mxu1 %v726_v27  ;;  %v998_v27 = vld [vmem:[#allocation17 + $0x48] sm:$0xff] }
 0x45d   :  { %1496 = vmatprep.subr.mxu1 %v1889_v0 }
 0x45e   :  { %1497 = vmatpush3.msra.mxu1 %v725_v28  ;;  %v997_v28 = vld [vmem:[#allocation17 + $0x40] sm:$0xff] }
 0x45f   :  { %1498 = vmatprep.subr.mxu1 %v1889_v0 }
 0x460   :  { %1499 = vmatpush3.msra.mxu1 %v724_v29  ;;  %v996_v29 = vld [vmem:[#allocation17 + $0x38] sm:$0xff] }
 0x461   :  { %1500 = vmatprep.subr.mxu1 %v1889_v0 }
 0x462   :  { %1501 = vmatpush3.msra.mxu1 %v723_v30  ;;  %v995_v30 = vld [vmem:[#allocation17 + $0x30] sm:$0xff] }
 0x463   :  { %1502 = vmatprep.subr.mxu1 %v1889_v0 }
 0x464   :  { %1503 = vmatpush3.msra.mxu1 %v722_v31  ;;  %v994_v31 = vld [vmem:[#allocation17 + $0x28] sm:$0xff] }
 0x465   :  { %1504 = vmatprep.subr.mxu1 %v1889_v0 }
 0x466   :  { %1505 = vmatpush3.msra.mxu1 %v721_v32  ;;  %v993_v32 = vld [vmem:[#allocation17 + $0x20] sm:$0xff] }
 0x467   :  { %1506 = vmatprep.subr.mxu1 %v1889_v0 }
 0x468   :  { %1507 = vmatpush3.msra.mxu1 %v720_v33  ;;  %v992_v33 = vld [vmem:[#allocation17 + $0x18] sm:$0xff] }
 0x469   :  { %1508 = vmatprep.subr.mxu1 %v1889_v0 }
 0x46a   :  { %1509 = vmatpush3.msra.mxu1 %v719_v34  ;;  %v1188_v34 = vld [vmem:[%s2242_s13] ss:$0 sm:$0xff] }
 0x46b   :  { %1510 = vmatprep.subr.mxu1 %v1889_v0 }
 0x46c   :  { %1511 = vmatpush3.msra.mxu1 %v718_v35 }
 0x46d   :  { %1512 = vmatprep.subr.mxu1 %v1889_v0 }
 0x46e   :  { %1513 = vmatpush3.msra.mxu1 %v717_v36 }
 0x46f   :  { %1514 = vmatprep.subr.mxu1 %v1889_v0 }
 0x470   :  { %1515 = vmatpush3.msra.mxu1 %v716_v37 }
 0x471   :  { %1516 = vmatprep.subr.mxu1 %v1889_v0 }
 0x472   :  { %1517 = vmatpush3.msra.mxu1 %v715_v38 }
 0x473   :  { %1518 = vmatprep.subr.mxu1 %v1889_v0 }
 0x474   :  { %1519 = vmatpush3.msra.mxu1 %v714_v44 }
 0x475   :  { %1558 = vmatprep.subr.mxu1 %v1889_v0 }
 0x515   :  { %v709_v40 = vpop.f32.mrf.mxu1 }
 0x516   :  { %v710_v41 = vadd.f32 %v1185_v39, %v709_v40  ;;  %v991_v39 = vld [vmem:[#allocation17 + $0x10] sm:$0xff]  ;;  %v990_v40 = vld [vmem:[#allocation17 + $0x8] sm:$0xff] }
 0x517   :  { %v1482_v42 = vpop.f32.mrf.mxu1 }
 0x518   :  { %v713_v43 = vmax.f32 %v710_v41, 0.0  ;;  %v989_v41 = vld [vmem:[#allocation17] sm:$0xff]  ;;  %v1189_v42 = vld [vmem:[%s2244_s15] ss:$0 sm:$0xff] }
 0x51a   :  { %1484 = vmatpush3.msra.mxu0 %v713_v43 }
 0x51b   :  { %1486 = vmatmul.mubr.msk.f32.vlgmr.msra.gmra.mxu0 %vm228_vm1, %v2047_v2  ;;  %1523 = vmatprep.subr.mxu0 %v1889_v0  ;;  %v742_v2 = vld [vmem:[#allocation14 + $0x58] sm:$0xff] }
 0x51c   :  { %1555 = vmatprep.mubr.msk.f32.mxu0 %vm1890_vm0, %v1889_v0  ;;  %1524 = vmatpush3.msra.mxu0 %v746_v45 }
 0x51d   :  { %1525 = vmatprep.subr.mxu0 %v1889_v0 }
 0x51e   :  { %1526 = vmatpush3.msra.mxu0 %v745_v46 }
 0x51f   :  { %1527 = vmatprep.subr.mxu0 %v1889_v0 }
 0x520   :  { %1528 = vmatpush3.msra.mxu0 %v744_v47  ;;  %v1190_v47 = vld [vmem:[%s2246_s17] ss:$0 sm:$0xff] }
 0x521   :  { %1529 = vmatprep.subr.mxu0 %v1889_v0 }
 0x522   :  { %1530 = vmatpush3.msra.mxu0 %v743_v48 }
 0x523   :  { %1531 = vmatprep.subr.mxu0 %v1889_v0 }
 0x524   :  { %1532 = vmatpush3.msra.mxu0 %v742_v2 }
 0x525   :  { %1533 = vmatprep.subr.mxu0 %v1889_v0 }
 0x526   :  { %1534 = vmatpush3.msra.mxu0 %v741_v49 }
 0x527   :  { %1535 = vmatprep.subr.mxu0 %v1889_v0 }
 0x528   :  { %1536 = vmatpush3.msra.mxu0 %v740_v50 }
 0x529   :  { %1537 = vmatprep.subr.mxu0 %v1889_v0 }
 0x52a   :  { %1538 = vmatpush3.msra.mxu0 %v739_v51 }
 0x52b   :  { %1539 = vmatprep.subr.mxu0 %v1889_v0 }
 0x52c   :  { %1540 = vmatpush3.msra.mxu0 %v738_v52 }
 0x52d   :  { %1541 = vmatprep.subr.mxu0 %v1889_v0 }
 0x52e   :  { %1542 = vmatpush3.msra.mxu0 %v737_v53 }
 0x52f   :  { %1543 = vmatprep.subr.mxu0 %v1889_v0 }
 0x530   :  { %1544 = vmatpush3.msra.mxu0 %v736_v54 }
 0x531   :  { %1545 = vmatprep.subr.mxu0 %v1889_v0 }
 0x532   :  { %1546 = vmatpush3.msra.mxu0 %v735_v55 }
 0x533   :  { %1547 = vmatprep.subr.mxu0 %v1889_v0 }
 0x534   :  { %1548 = vmatpush3.msra.mxu0 %v734_v56 }
 0x535   :  { %1549 = vmatprep.subr.mxu0 %v1889_v0 }
 0x536   :  { %1550 = vmatpush3.msra.mxu0 %v733_v59 }
 0x537   :  { %1551 = vmatprep.subr.mxu0 %v1889_v0 }
 0x538   :  { %1552 = vmatpush3.msra.mxu0 %v732_v60 }
 0x539   :  { %1553 = vmatprep.subr.mxu0 %v1889_v0 }
 0x53a   :  { %1554 = vmatpush3.msra.mxu0 %v731_v61 }
 0x53b   :  { %1593 = vmatprep.subr.mxu0 %v1889_v0 }
 0x5db   :  { %v814_v57 = vpop.f32.mrf.mxu0 }
 0x5dc   :  { %1521 = vmatmul.mubr.f32.vlgmr.msra.gmra.mxu1 %v814_v57 }
 0x5dd   :  { %v1487_v58 = vpop.f32.mrf.mxu0  ;;  %1590 = vmatprep.mubr.msk.f32.mxu1 %vm1890_vm0, %v1889_v0  ;;  %1559 = vmatpush3.msra.mxu1 %v987_v62 }
 0x5de   :  { %1560 = vmatprep.subr.mxu1 %v1889_v0 }
 0x5df   :  { %1561 = vmatpush3.msra.mxu1 %v986_v63 }
 0x5e0   :  { %1562 = vmatprep.subr.mxu1 %v1889_v0 }
 0x5e1   :  { %1563 = vmatpush3.msra.mxu1 %v985_v1 }
 0x5e2   :  { %1564 = vmatprep.subr.mxu1 %v1889_v0 }
 0x5e3   :  { %1565 = vmatpush3.msra.mxu1 %v984_v3 }
 0x5e4   :  { %1566 = vmatprep.subr.mxu1 %v1889_v0 }
 0x5e5   :  { %1567 = vmatpush3.msra.mxu1 %v983_v4 }
 0x5e6   :  { %1568 = vmatprep.subr.mxu1 %v1889_v0 }
 0x5e7   :  { %1569 = vmatpush3.msra.mxu1 %v982_v5 }
 0x5e8   :  { %1570 = vmatprep.subr.mxu1 %v1889_v0 }
 0x5e9   :  { %1571 = vmatpush3.msra.mxu1 %v981_v6 }
 0x5ea   :  { %1572 = vmatprep.subr.mxu1 %v1889_v0 }
 0x5eb   :  { %1573 = vmatpush3.msra.mxu1 %v980_v7 }
 0x5ec   :  { %1574 = vmatprep.subr.mxu1 %v1889_v0 }
 0x5ed   :  { %1575 = vmatpush3.msra.mxu1 %v979_v8 }
 0x5ee   :  { %1576 = vmatprep.subr.mxu1 %v1889_v0 }
 0x5ef   :  { %1577 = vmatpush3.msra.mxu1 %v978_v9 }
 0x5f0   :  { %1578 = vmatprep.subr.mxu1 %v1889_v0 }
 0x5f1   :  { %1579 = vmatpush3.msra.mxu1 %v977_v10 }
 0x5f2   :  { %1580 = vmatprep.subr.mxu1 %v1889_v0 }
 0x5f3   :  { %1581 = vmatpush3.msra.mxu1 %v976_v11 }
 0x5f4   :  { %1582 = vmatprep.subr.mxu1 %v1889_v0 }
 0x5f5   :  { %1583 = vmatpush3.msra.mxu1 %v975_v12 }
 0x5f6   :  { %1584 = vmatprep.subr.mxu1 %v1889_v0 }
 0x5f7   :  { %1585 = vmatpush3.msra.mxu1 %v974_v18 }
 0x5f8   :  { %1586 = vmatprep.subr.mxu1 %v1889_v0 }
 0x5f9   :  { %1587 = vmatpush3.msra.mxu1 %v973_v19 }
 0x5fa   :  { %1588 = vmatprep.subr.mxu1 %v1889_v0 }
 0x5fb   :  { %1589 = vmatpush3.msra.mxu1 %v972_v20 }
 0x69c   :  { %v890_v14 = vpop.f32.mrf.mxu1 }
 0x69d   :  { %v891_v15 = vadd.f32 %v1187_v13, %v890_v14 }
 0x69e   :  { %v1522_v16 = vpop.f32.mrf.mxu1 }
 0x69f   :  { %v894_v17 = vmax.f32 %v891_v15, 0.0 }
 0x6a1   :  { %1556 = vmatmul.mubr.f32.vlgmr.msra.gmra.mxu0 %v894_v17 }
 0x6a2   :  { %1625 = vmatprep.mubr.msk.f32.mxu0 %vm1890_vm0, %v1889_v0  ;;  %1594 = vmatpush3.msra.mxu0 %v1004_v21 }
 0x6a3   :  { %1595 = vmatprep.subr.mxu0 %v1889_v0 }
 0x6a4   :  { %1596 = vmatpush3.msra.mxu0 %v1003_v22 }
 0x6a5   :  { %1597 = vmatprep.subr.mxu0 %v1889_v0 }
 0x6a6   :  { %1598 = vmatpush3.msra.mxu0 %v1002_v23 }
 0x6a7   :  { %1599 = vmatprep.subr.mxu0 %v1889_v0 }
 0x6a8   :  { %1600 = vmatpush3.msra.mxu0 %v1001_v24 }
 0x6a9   :  { %1601 = vmatprep.subr.mxu0 %v1889_v0 }
 0x6aa   :  { %1602 = vmatpush3.msra.mxu0 %v1000_v25 }
 0x6ab   :  { %1603 = vmatprep.subr.mxu0 %v1889_v0 }
 0x6ac   :  { %1604 = vmatpush3.msra.mxu0 %v999_v26 }
 0x6ad   :  { %1605 = vmatprep.subr.mxu0 %v1889_v0 }
 0x6ae   :  { %1606 = vmatpush3.msra.mxu0 %v998_v27 }
 0x6af   :  { %1607 = vmatprep.subr.mxu0 %v1889_v0 }
 0x6b0   :  { %1608 = vmatpush3.msra.mxu0 %v997_v28 }
 0x6b1   :  { %1609 = vmatprep.subr.mxu0 %v1889_v0 }
 0x6b2   :  { %1610 = vmatpush3.msra.mxu0 %v996_v29 }
 0x6b3   :  { %1611 = vmatprep.subr.mxu0 %v1889_v0 }
 0x6b4   :  { %1612 = vmatpush3.msra.mxu0 %v995_v30 }
 0x6b5   :  { %1613 = vmatprep.subr.mxu0 %v1889_v0 }
 0x6b6   :  { %1614 = vmatpush3.msra.mxu0 %v994_v31 }
 0x6b7   :  { %1615 = vmatprep.subr.mxu0 %v1889_v0 }
 0x6b8   :  { %1616 = vmatpush3.msra.mxu0 %v993_v32 }
 0x6b9   :  { %1617 = vmatprep.subr.mxu0 %v1889_v0 }
 0x6ba   :  { %1618 = vmatpush3.msra.mxu0 %v992_v33 }
 0x6bb   :  { %1619 = vmatprep.subr.mxu0 %v1889_v0 }
 0x6bc   :  { %1620 = vmatpush3.msra.mxu0 %v991_v39 }
 0x6bd   :  { %1621 = vmatprep.subr.mxu0 %v1889_v0 }
 0x6be   :  { %1622 = vmatpush3.msra.mxu0 %v990_v40 }
 0x6bf   :  { %1623 = vmatprep.subr.mxu0 %v1889_v0 }
 0x6c0   :  { %1624 = vmatpush3.msra.mxu0 %v989_v41 }
 0x761   :  { %v967_v35 = vpop.f32.mrf.mxu0 }
 0x762   :  { %v968_v36 = vadd.f32 %v1188_v34, %v967_v35 }
 0x763   :  { %v1557_v37 = vpop.f32.mrf.mxu0 }
 0x764   :  { %v971_v38 = vmax.f32 %v968_v36, 0.0 }
 0x766   :  { %1591 = vmatmul.mubr.f32.vlgmr.msra.gmra.mxu1 %v971_v38 }
 0x826   :  { %v1078_v43 = vpop.f32.mrf.mxu1 }
 0x827   :  { %v1079_v44 = vadd.f32 %v1189_v42, %v1078_v43 }
 0x828   :  { %v1592_v45 = vpop.f32.mrf.mxu1 }
 0x829   :  { %v1082_v46 = vmax.f32 %v1079_v44, 0.0 }
 0x82b   :  { %1626 = vmatmul.mubr.f32.vlgmr.msra.gmra.mxu0 %v1082_v46 }
 0x8eb   :  { %v1155_v48 = vpop.f32.mrf.mxu0 }
 0x8ec   :  { %v1156_v2 = vadd.f32 %v1190_v47, %v1155_v48 }
 0x8ed   :  { %v1627_v0 = vpop.f32.mrf.mxu0 }
 0x8ee   :  { %1159 = vst [vmem:[#allocation19] sm:$0xff] %v1156_v2 }
 0x8ef   :  { %1854 = shalt.err (!%p1851_p12)
}
 0x8f0   :  { %1169 = dma.vmem_to_hbm [thread:$0]  %s1167_s25, 128, %s2247_s18, [#allocation4]  }
 0x8f1   :  { %1875 = dma.done.wait [#allocation4], 128  }
 0x8f2   :  { %1876 = vsyncadd [#allocation4], 4294967168 }
 0x8f3   :  { %1173 = vsyncpa [#allocation3], 1 }
 0x8f4   :  { %1174 = vsyncpa [#allocation6], 1 }
 0x8f5   :  { %1175 = vsyncpa [#allocation9], 1 }
 0x8f6   :  { %1176 = vsyncpa [#allocation12], 1 }
 0x8f7   :  { %1177 = vsyncpa [#allocation15], 1 }
 0x8f8   :  { %1178 = vsyncpa [#allocation18], 1 }
 0x8f9   :  { %1179 = vsyncpa [#allocation4], 1 }

</bundles_post_ra>
